<compile_context>
chip_gen: v6e
topology: v6e:2x2x1
jax: 0.10.0
libtpu: 0.0.40
codegen_flags: <defaults>
</compile_context>

<pallas_src>
import jax
import jax.numpy as jnp
import numpy as np
from jax.experimental import pallas as pl
from jax.experimental.pallas import tpu as pltpu


def _round_up(x, m):
    return ((x + m - 1) // m) * m


def _vmem_estimate(tile, dp):
    """Rough per-call VMEM footprint (bytes) for one gallery tile size."""
    return (2 * tile * dp * 2        # double-buffered bf16 gallery tile
            + 2 * dp * dp * 2        # W (constant index map, default buffering)
            + 2 * tile * dp * 4      # gp / gp_n f32 temporaries
            + 4 * tile * 4           # score-row blocks / intermediates
            + 4 * dp * 6             # pinned query vectors
            + (2 << 20))             # slack


def _pick_tile(ng, dp, tile_ng):
    """Largest power-of-two multiple of 128 <= tile_ng that fits the budget."""
    cap = min(tile_ng, _round_up(ng, 128))
    tile = 128
    while tile * 2 <= cap and _vmem_estimate(tile * 2, dp) <= 40 * 1024 * 1024:
        tile *= 2
    return tile


def _ctx_graph_scores_kernel(g_ref, qr_ref, qg_ref, w_ref, out_ref):
    """Raw fused scores for one gallery tile (grid steps are independent).

    g_ref   : VMEM (T, Dp)  bf16  gallery tile (zero-padded rows/cols)
    qr_ref  : VMEM (1, Dp)  bf16  (1 - graph_thred) * query_target       (pinned)
    qg_ref  : VMEM (1, Dp)  f32   graph_thred * normalize(query_target@W) (pinned)
    w_ref   : VMEM (Dp, Dp) bf16  graph-head projection weight            (pinned)
    out_ref : VMEM (1, T)   f32   lane-dense raw score row for this tile
    """
    g_bf = g_ref[...]                                                     # [T, Dp]

    # Gallery projection on the MXU (bf16 x bf16 -> f32 accumulate) + row norms.
    gp = jnp.dot(g_bf, w_ref[...], preferred_element_type=jnp.float32)    # [T, Dp]
    inv_norm = jax.lax.rsqrt(jnp.sum(gp * gp, axis=-1, keepdims=True) + 1e-12)
    gp_n = gp * inv_norm                                                  # [T, Dp]

    # Lane-dense [1, T] numerators: contract over D (lhs @ rhs.T) so the
    # per-gallery-row scores land on lanes, not sublanes.
    dims = (((1,), (1,)), ((), ()))
    reid_row = jax.lax.dot_general(qr_ref[...], g_bf, dims,
                                   preferred_element_type=jnp.float32)    # [1, T]
    graph_row = jax.lax.dot_general(qg_ref[...], gp_n, dims,
                                    preferred_element_type=jnp.float32)   # [1, T]

    # Padded gallery rows are all-zero -> score exactly 0; they are sliced off
    # in the wrapper before the softmax, so no masking is needed here.
    out_ref[...] = reid_row + graph_row


def prepare_gallery(gallery_embeddings, *, tile_ng=1024):
    """Pad + bf16-cast the query-independent gallery once; reuse across queries."""
    ng, d = gallery_embeddings.shape
    dp = _round_up(d, 128)
    tile = _pick_tile(ng, dp, tile_ng)
    ng_pad = _round_up(ng, tile)
    g_pad = jnp.zeros((ng_pad, dp), jnp.bfloat16)
    g_pad = g_pad.at[:ng, :d].set(gallery_embeddings.astype(jnp.bfloat16))
    return g_pad, tile


def ctx_graph_head_inference(gallery_embeddings, query_ctx_embedding,
                             query_target_embedding, w_proj, graph_thred,
                             *, tile_ng=1024, prepared_gallery=None):
    """JAX wrapper mirroring ContextGraphHead.inference."""
    ng, d = gallery_embeddings.shape

    # Early-exit branch of the PyTorch code (no context): plain reid matmul.
    if query_ctx_embedding.shape[0] == 0:
        return jnp.matmul(gallery_embeddings, query_target_embedding.T)

    # NOTE: query_ctx_embedding only gates the early exit above; its projection
    # is numerically dead for this graph head (only sim[:, -1] is consumed and
    # the row-wise L2 norm makes that column depend only on the target row).

    dp = _round_up(d, 128)
    if prepared_gallery is None:
        prepared_gallery = prepare_gallery(gallery_embeddings, tile_ng=tile_ng)
    g_pad, tile = prepared_gallery
    ng_pad = g_pad.shape[0]
    n_tiles = ng_pad // tile

    # Grid-invariant query-side work, hoisted into (tiny) XLA ops.
    t = jnp.float32(graph_thred)
    qt = query_target_embedding.astype(jnp.float32)                       # [1, d]
    qp = qt @ w_proj.astype(jnp.float32)                                  # [1, d]
    qp_n = qp * jax.lax.rsqrt(jnp.sum(qp * qp, axis=-1, keepdims=True) + 1e-12)

    qr_pad = jnp.zeros((1, dp), jnp.bfloat16)
    qr_pad = qr_pad.at[:, :d].set(((1.0 - t) * qt).astype(jnp.bfloat16))
    qg_pad = jnp.zeros((1, dp), jnp.float32)
    qg_pad = qg_pad.at[:, :d].set(t * qp_n)
    w_pad = jnp.zeros((dp, dp), jnp.bfloat16)
    w_pad = w_pad.at[:d, :d].set(w_proj.astype(jnp.bfloat16))

    vmem_limit = int(min(60 << 20, max(32 << 20, _vmem_estimate(tile, dp))))

    raw = pl.pallas_call(
        _ctx_graph_scores_kernel,
        out_shape=jax.ShapeDtypeStruct((1, ng_pad), jnp.float32),
        grid=(n_tiles,),
        in_specs=[
            pl.BlockSpec((tile, dp), lambda i: (i, 0)),   # gallery tiles
            pl.BlockSpec((1, dp), lambda i: (0, 0)),      # (1-t) * qt     (pinned)
            pl.BlockSpec((1, dp), lambda i: (0, 0)),      # t * qp_n       (pinned)
            pl.BlockSpec((dp, dp), lambda i: (0, 0)),     # W              (pinned)
        ],
        out_specs=pl.BlockSpec((1, tile), lambda i: (0, i)),
        compiler_params=pltpu.CompilerParams(
            # Grid steps are independent -> shard across TensorCores on v7x.
            dimension_semantics=("parallel",),
            vmem_limit_bytes=vmem_limit,
        ),
        cost_estimate=pl.CostEstimate(
            flops=2 * ng_pad * dp * dp + 6 * ng_pad * dp,
            transcendentals=ng_pad,
            bytes_accessed=ng_pad * dp * 2 + dp * dp * 2 + ng_pad * 4 + dp * 12,
        ),
    )(g_pad, qr_pad, qg_pad, w_pad)

    # O(Ng) epilogue in XLA on the unpadded score vector (negligible next to the
    # projection matmul; keeps the kernel grid embarrassingly parallel).
    scores = raw[0, :ng]                                   # [Ng] raw fused scores
    sscores = jax.nn.softmax(scores, axis=0)
    out = sscores * scores / jnp.max(sscores)
    return out[:, None]                                    # [Ng, 1], matching torch


def _reference(gallery, qctx, qtgt, w, thred):
    """Pure-JAX f32 reference (keeps the full context path and [Ng,Nq] sim)."""
    reid = gallery @ qtgt.T
    q = jnp.concatenate([qctx, qtgt], axis=0)
    gp = gallery @ w
    qp = q @ w
    gp = gp / jnp.sqrt(jnp.sum(gp * gp, axis=-1, keepdims=True) + 1e-12)
    qp = qp / jnp.sqrt(jnp.sum(qp * qp, axis=-1, keepdims=True) + 1e-12)
    sim = gp @ qp.T
    graph_scores = sim[:, -1:]
    scores = thred * graph_scores + (1.0 - thred) * reid
    sscores = jax.nn.softmax(scores, axis=0)
    return sscores * scores / jnp.max(sscores)


if __name__ == "__main__":
    key = jax.random.PRNGKey(0)
    k1, k2, k3, k4 = jax.random.split(key, 4)

    Ng, Nc, D = 16, 7, 32          # gallery persons, query context persons, embed dim

    def _l2norm(x):
        return x / jnp.linalg.norm(x, axis=-1, keepdims=True)

    gallery = _l2norm(jax.random.normal(k1, (Ng, D), dtype=jnp.float32))
    query_ctx = _l2norm(jax.random.normal(k2, (Nc, D), dtype=jnp.float32))
    query_tgt = _l2norm(jax.random.normal(k3, (1, D), dtype=jnp.float32))
    w_proj = jax.random.normal(k4, (D, D), dtype=jnp.float32) * (1.0 / np.sqrt(D))
    graph_thred = 0.4

    out = ctx_graph_head_inference(gallery, query_ctx, query_tgt, w_proj, graph_thred)
    out = jax.block_until_ready(out)

    ref = _reference(gallery, query_ctx, query_tgt, w_proj, graph_thred)
    ref = jax.block_until_ready(ref)

    assert out.shape == (Ng, 1)
    # Tolerance is bf16-level: the projection matmul / gallery / reid dot are
    # bf16 in the kernel; the softmax/rescale epilogue is exact f32 in XLA.
    np.testing.assert_allclose(np.asarray(out), np.asarray(ref), rtol=2e-2, atol=2e-2)

    print("KERNEL_OK")
</pallas_src>

<mosaic_0001>
module attributes {stable_mosaic.version = 11 : i64} {
  func.func @_ctx_graph_scores_kernel(%arg0: i32, %arg1: memref<128x128xbf16, #tpu.memory_space<vmem>>, %arg2: memref<1x128xbf16, #tpu.memory_space<vmem>>, %arg3: memref<1x128xf32, #tpu.memory_space<vmem>>, %arg4: memref<128x128xbf16, #tpu.memory_space<vmem>>, %arg5: memref<1x128xf32, #tpu.memory_space<vmem>>) attributes {dimension_semantics = [#tpu.dimension_semantics<parallel>], iteration_bounds = array<i64: 1>, scalar_prefetch = 0 : i64, scratch_operands = 0 : i64, tpu.core_type = #tpu.core_type<tc>, window_params = [{transform_indices = @transform_0, window_bounds = array<i64: 128, 128>}, {pipeline_mode = #tpu.pipeline_mode<synchronous>, transform_indices = @transform_1, window_bounds = array<i64: 1, 128>}, {pipeline_mode = #tpu.pipeline_mode<synchronous>, transform_indices = @transform_2, window_bounds = array<i64: 1, 128>}, {pipeline_mode = #tpu.pipeline_mode<synchronous>, transform_indices = @transform_3, window_bounds = array<i64: 128, 128>}, {transform_indices = @transform_4, window_bounds = array<i64: 1, 128>}]} {
    %c0 = arith.constant 0 : index
    %c0_0 = arith.constant 0 : index
    %0 = vector.load %arg1[%c0, %c0_0] : memref<128x128xbf16, #tpu.memory_space<vmem>>, vector<128x128xbf16>
    %c0_1 = arith.constant 0 : index
    %c0_2 = arith.constant 0 : index
    %1 = vector.load %arg4[%c0_1, %c0_2] : memref<128x128xbf16, #tpu.memory_space<vmem>>, vector<128x128xbf16>
    %cst = arith.constant dense<0.000000e+00> : vector<128x128xf32>
    %2 = tpu.matmul %0, %1, %cst {dimension_numbers = #tpu.dot_dimension_numbers<[1], [0], [0], [1], [0, 0, 1, 1], [], []>} : vector<128x128xbf16>, vector<128x128xbf16>, vector<128x128xf32> -> vector<128x128xf32>
    %3 = arith.mulf %2, %2 : vector<128x128xf32>
    %cst_3 = arith.constant dense<0.000000e+00> : vector<128xf32>
    %4 = vector.multi_reduction <add>, %3, %cst_3 [1] : vector<128x128xf32> to vector<128xf32>
    %5 = vector.shape_cast %4 : vector<128xf32> to vector<128x1xf32>
    %cst_4 = arith.constant 9.99999996E-13 : f32
    %6 = vector.broadcast %cst_4 : f32 to vector<128x1xf32>
    %7 = arith.addf %5, %6 : vector<128x1xf32>
    %8 = math.rsqrt %7 : vector<128x1xf32>
    %9 = vector.broadcast %8 : vector<128x1xf32> to vector<128x128xf32>
    %10 = arith.mulf %2, %9 : vector<128x128xf32>
    %c0_5 = arith.constant 0 : index
    %c0_6 = arith.constant 0 : index
    %11 = vector.load %arg2[%c0_5, %c0_6] : memref<1x128xbf16, #tpu.memory_space<vmem>>, vector<1x128xbf16>
    %cst_7 = arith.constant dense<0.000000e+00> : vector<1x128xf32>
    %12 = tpu.matmul %11, %0, %cst_7 {dimension_numbers = #tpu.dot_dimension_numbers<[1], [1], [0], [0], [0, 0, 1, 0], [], []>} : vector<1x128xbf16>, vector<128x128xbf16>, vector<1x128xf32> -> vector<1x128xf32>
    %c0_8 = arith.constant 0 : index
    %c0_9 = arith.constant 0 : index
    %13 = vector.load %arg3[%c0_8, %c0_9] : memref<1x128xf32, #tpu.memory_space<vmem>>, vector<1x128xf32>
    %cst_10 = arith.constant dense<0.000000e+00> : vector<1x128xf32>
    %14 = tpu.matmul %13, %10, %cst_10 {dimension_numbers = #tpu.dot_dimension_numbers<[1], [1], [0], [0], [0, 0, 1, 0], [], []>} : vector<1x128xf32>, vector<128x128xf32>, vector<1x128xf32> -> vector<1x128xf32>
    %15 = arith.addf %12, %14 : vector<1x128xf32>
    %c0_11 = arith.constant 0 : index
    %c0_12 = arith.constant 0 : index
    %16 = vector.load %arg5[%c0_11, %c0_12] : memref<1x128xf32, #tpu.memory_space<vmem>>, vector<1x128xf32>
    tpu.vector_store %arg5[%c0_11, %c0_12], %15 {strides = array<i32>} : memref<1x128xf32, #tpu.memory_space<vmem>>, vector<1x128xf32>,
    return
  }
  func.func @transform_0(%arg0: i32) -> (i32, i32) {
    %c0_i32 = arith.constant 0 : i32
    %c0_i32_0 = arith.constant 0 : i32
    return %arg0, %c0_i32 : i32, i32
  }
  func.func @transform_1(%arg0: i32) -> (i32, i32) {
    %c0_i32 = arith.constant 0 : i32
    %c0_i32_0 = arith.constant 0 : i32
    %c0_i32_1 = arith.constant 0 : i32
    return %c0_i32, %c0_i32_0 : i32, i32
  }
  func.func @transform_2(%arg0: i32) -> (i32, i32) {
    %c0_i32 = arith.constant 0 : i32
    %c0_i32_0 = arith.constant 0 : i32
    %c0_i32_1 = arith.constant 0 : i32
    return %c0_i32, %c0_i32_0 : i32, i32
  }
  func.func @transform_3(%arg0: i32) -> (i32, i32) {
    %c0_i32 = arith.constant 0 : i32
    %c0_i32_0 = arith.constant 0 : i32
    %c0_i32_1 = arith.constant 0 : i32
    return %c0_i32, %c0_i32_0 : i32, i32
  }
  func.func @transform_4(%arg0: i32) -> (i32, i32) {
    %c0_i32 = arith.constant 0 : i32
    %c0_i32_0 = arith.constant 0 : i32
    return %c0_i32, %arg0 : i32, i32
  }
}

</mosaic_0001>

<bundles_post_ra>
// kernel: tpu_custom_call.1
= control target key start
LH: loop header
LB: loop body
LE: loop exit
PB: predicated region body
PF: predicated region fallthrough
CT: control target
= control target key end

     0   :  { %9 = vsyncpa [#allocation3], 0  ;;  %s936_s0 = inlined_call_operand.hbm [shape: bf16[128,128], index: 0, kind: input, shape index: {}]   ;;  %s937_s1 = inlined_call_operand.vmem [shape: bf16[1,128], index: 1, kind: input, shape index: {}]   ;;  %s938_s2 = inlined_call_operand.vmem [shape: f32[1,128], index: 2, kind: input, shape index: {}]   ;;  %s939_s3 = inlined_call_operand.hbm [shape: bf16[128,128], index: 3, kind: input, shape index: {}]   ;;  %s940_s4 = inlined_call_operand.hbm [shape: f32[1,128], index: 4, kind: output, shape index: {}]  }
   0x1   :  { %10 = vsyncpa [#allocation6], 0 }
   0x2   :  { %11 = vsyncpa [#allocation4], 0  ;;  %s763_s15 = smov [#allocation2]  }
   0x3   :  { %s17_s16 = sshll.u32 %s763_s15, 4  ;;  %s18_s16 = int_to_ptr.vmem [resolvable:$true] %s17_s16 }
   0x4   :  { %s705_s17 = scalar_lea.vmem %s18_s16, 1024  ;;  %p710_p1 = scmp.lt.s32.totalorder %s18_s16, %s18_s16 }
   0x5   :  { %p706_p0 = scmp.ne.s32.totalorder %s18_s16, %s705_s17  ;;  %p711_p2 = scmp.lt.s32.totalorder %s705_s17, %s705_s17 }
   0x7   :  { %p712_p3 = por %p711_p2, %p710_p1 }
   0x9   :  { %p713_p4 = pnand %p712_p3, %p706_p0 }
   0xb   :  { %716 = shalt.err (!%p713_p4)
}
   0xc   :  { %s764_s18 = smov 64   ;;  %s765_s19 = smov 4  }
   0xd   :  { %23 = dma.hbm_to_vmem [thread:$0]  %s936_s0, 1024, %s18_s16, [#allocation3], %s764_s18, %s764_s18, %s765_s19  }
   0xe   :  { %s766_s22 = smov [#allocation5]  }
   0xf   :  { %s33_s23 = sshll.u32 %s766_s22, 4  ;;  %s34_s23 = int_to_ptr.vmem [resolvable:$true] %s33_s23 }
  0x10   :  { %s725_s24 = scalar_lea.vmem %s34_s23, 1024  ;;  %p730_p6 = scmp.lt.s32.totalorder %s34_s23, %s34_s23 }
  0x11   :  { %p726_p5 = scmp.ne.s32.totalorder %s34_s23, %s725_s24  ;;  %p731_p7 = scmp.lt.s32.totalorder %s725_s24, %s725_s24 }
  0x13   :  { %p732_p8 = por %p731_p7, %p730_p6 }
  0x15   :  { %p733_p9 = pnand %p732_p8, %p726_p5 }
  0x17   :  { %736 = shalt.err (!%p733_p9)
}
  0x18   :  { %39 = dma.hbm_to_vmem [thread:$0]  %s939_s3, 1024, %s34_s23, [#allocation6], %s764_s18, %s764_s18, %s765_s19  }
  0x19   :  { %757 = dma.done.wait [#allocation3], 1024  }
  0x1a   :  { %758 = vsyncadd [#allocation3], 4294966272 }
  0x1b   :  { %759 = dma.done.wait [#allocation6], 1024  }
  0x1c   :  { %760 = vsyncadd [#allocation6], 4294966272  ;;  %v649_v0 = vld [vmem:[#allocation5 + $0x38] sm:$0xff]   ;;  %v650_v1 = vld [vmem:[#allocation5 + $0x30] sm:$0xff]   ;;  %v767_v43 = vmov 0.0   ;;  %vm768_vm0 = vmmov 0  }
  0x1d   :  { %555 = vmatprep.subr.bf16.mxu1 %v649_v0  ;;  %v651_v2 = vld [vmem:[#allocation5 + $0x28] sm:$0xff]   ;;  %v652_v3 = vld [vmem:[#allocation5 + $0x20] sm:$0xff]   ;;  %v653_v5 = vld [vmem:[#allocation5 + $0x18] sm:$0xff]   ;;  %622 = vmatprep.subr.bf16.mxu0 %v767_v43  ;;  %s769_s28 = smov [#allocation7]  }
  0x1e   :  { %556 = vmatpush3.bf16.msra.mxu1 %v649_v0  ;;  %v801_v4 = vld [vmem:[#allocation2] sm:$0xff]   ;;  %v654_v6 = vld [vmem:[#allocation5 + $0x10] sm:$0xff]   ;;  %v655_v7 = vld [vmem:[#allocation5 + $0x8] sm:$0xff]   ;;  %638 = vmatprep.mubr.msk.bf16.mxu0 %vm768_vm0, %v767_v43  ;;  %s487_s29 = sshll.u32 %s769_s28, 4  ;;  %s488_s29 = int_to_ptr.vmem [resolvable:$true] %s487_s29 }
  0x1f   :  { %557 = vmatprep.subr.bf16.mxu1 %v650_v1  ;;  %571 = vmatprep.mubr.bf16.mxu1 %v801_v4  ;;  %v656_v8 = vld [vmem:[#allocation5] sm:$0xff]   ;;  %v804_v9 = vld [vmem:[#allocation2 + $0x8] sm:$0xff]   ;;  %v806_v10 = vld [vmem:[#allocation2 + $0x10] sm:$0xff]   ;;  %s737_s30 = scalar_lea.vmem %s488_s29, 16  ;;  %s741_s5 = scalar_lea.vmem %s488_s29, 32 }
  0x20   :  { %v810_v11 = vld [vmem:[#allocation2 + $0x18] sm:$0xff]   ;;  %v812_v12 = vld [vmem:[#allocation2 + $0x20] sm:$0xff]   ;;  %v662_v13 = vld [vmem:[#allocation2 + $0x28] sm:$0xff]   ;;  %p738_p10 = scmp.ne.s32.totalorder %s488_s29, %s737_s30  ;;  %p742_p11 = scmp.lt.s32.totalorder %s488_s29, %s488_s29 }
  0x21   :  { %v663_v14 = vld [vmem:[#allocation2 + $0x30] sm:$0xff]   ;;  %v664_v15 = vld [vmem:[#allocation2 + $0x38] sm:$0xff]   ;;  %v368_v49 = vld [vmem:[%s937_s1] sm:$0x1]  ;;  %p743_p12 = scmp.lt.s32.totalorder %s741_s5, %s737_s30 }
  0x22   :  { %558 = vmatpush3.bf16.msra.mxu1 %v650_v1  ;;  %623 = vmatpush3.bf16.xpose.msra.mxu0 %v664_v15 }
  0x23   :  { %559 = vmatprep.subr.bf16.mxu1 %v651_v2  ;;  %624 = vmatprep.subr.bf16.mxu0 %v767_v43  ;;  %p744_p13 = por %p743_p12, %p742_p11 }
  0x25   :  { %p745_p0 = pnand %p744_p13, %p738_p10 }
  0x26   :  { %560 = vmatpush3.bf16.msra.mxu1 %v651_v2 }
  0x27   :  { %561 = vmatprep.subr.bf16.mxu1 %v652_v3 }
  0x2a   :  { %562 = vmatpush3.bf16.msra.mxu1 %v652_v3  ;;  %625 = vmatpush3.bf16.xpose.msra.mxu0 %v663_v14 }
  0x2b   :  { %563 = vmatprep.subr.bf16.mxu1 %v653_v5  ;;  %626 = vmatprep.subr.bf16.mxu0 %v767_v43 }
  0x2e   :  { %564 = vmatpush3.bf16.msra.mxu1 %v653_v5 }
  0x2f   :  { %565 = vmatprep.subr.bf16.mxu1 %v654_v6 }
  0x32   :  { %566 = vmatpush3.bf16.msra.mxu1 %v654_v6  ;;  %627 = vmatpush3.bf16.xpose.msra.mxu0 %v662_v13 }
  0x33   :  { %567 = vmatprep.subr.bf16.mxu1 %v655_v7  ;;  %628 = vmatprep.subr.bf16.mxu0 %v767_v43 }
  0x36   :  { %568 = vmatpush3.bf16.msra.mxu1 %v655_v7 }
  0x37   :  { %569 = vmatprep.subr.bf16.mxu1 %v656_v8 }
  0x3a   :  { %570 = vmatpush3.bf16.msra.mxu1 %v656_v8  ;;  %629 = vmatpush3.bf16.xpose.msra.mxu0 %v812_v12 }
  0x3b   :  { %587 = vmatprep.subr.mxu1 %v767_v43  ;;  %630 = vmatprep.subr.bf16.mxu0 %v767_v43 }
  0x3d   :  { %572 = vmatmul.mubr.bf16.vlgmr.msra.gmra.mxu1 %v804_v9 }
  0x3e   :  { %575 = vmatprep.mubr.bf16.mxu1 %v806_v10 }
  0x42   :  { %631 = vmatpush3.bf16.xpose.msra.mxu0 %v810_v11 }
  0x43   :  { %632 = vmatprep.subr.bf16.mxu0 %v767_v43 }
  0x45   :  { %576 = vmatmul.mubr.bf16.gmra.mxu1 %v810_v11 }
  0x46   :  { %579 = vmatprep.mubr.bf16.mxu1 %v812_v12 }
  0x4a   :  { %633 = vmatpush3.bf16.xpose.msra.mxu0 %v806_v10 }
  0x4b   :  { %634 = vmatprep.subr.bf16.mxu0 %v767_v43 }
  0x4d   :  { %580 = vmatmul.mubr.bf16.gmra.mxu1 %v662_v13 }
  0x4e   :  { %583 = vmatprep.mubr.bf16.mxu1 %v663_v14 }
  0x52   :  { %635 = vmatpush3.bf16.xpose.msra.mxu0 %v804_v9 }
  0x53   :  { %636 = vmatprep.subr.bf16.mxu0 %v767_v43 }
  0x55   :  { %584 = vmatmul.mubr.bf16.gmra.mxu1 %v664_v15 }
  0x56   :  { %619 = vmatprep.mubr.msk.f32.mxu1 %vm768_vm0, %v767_v43 }
  0x5a   :  { %637 = vmatpush3.bf16.xpose.msra.mxu0 %v801_v4 }
  0x61   :  { %639 = vmatmul.mubr.bf16.vlgmr.msra.gmra.mxu0 %v368_v49 }
  0xfd   :  { %v816_v16 = vpop.f32.mrf.mxu1 }
  0xfe   :  { %v274_v46 = vmul.f32 %v816_v16, %v816_v16 }
  0xff   :  { %v818_v17 = vpop.f32.mrf.mxu1 }
 0x100   :  { %v272_v48 = vmul.f32 %v818_v17, %v818_v17 }
 0x101   :  { %v820_v18 = vpop.f32.mrf.mxu1 }
 0x102   :  { %v275_v45 = vmul.f32 %v820_v18, %v820_v18 }
 0x103   :  { %v822_v19 = vpop.f32.mrf.mxu1 }
 0x104   :  { %v273_v47 = vmul.f32 %v822_v19, %v822_v19 }
 0x105   :  { %v824_v20 = vpop.f32.mrf.mxu1 }
 0x106   :  { %v278_v41 = vmul.f32 %v824_v20, %v824_v20 }
 0x107   :  { %v826_v21 = vpop.f32.mrf.mxu1 }
 0x108   :  { %v276_v44 = vmul.f32 %v826_v21, %v826_v21 }
 0x109   :  { %v828_v22 = vpop.f32.mrf.mxu1 }
 0x10a   :  { %v279_v40 = vmul.f32 %v828_v22, %v828_v22 }
 0x10b   :  { %v830_v23 = vpop.f32.mrf.mxu1 }
 0x10c   :  { %v277_v42 = vmul.f32 %v830_v23, %v830_v23 }
 0x10d   :  { %v832_v24 = vpop.f32.mrf.mxu1 }
 0x10e   :  { %v282_v37 = vmul.f32 %v832_v24, %v832_v24 }
 0x10f   :  { %v834_v25 = vpop.f32.mrf.mxu1 }
 0x110   :  { %v280_v39 = vmul.f32 %v834_v25, %v834_v25 }
 0x111   :  { %v836_v26 = vpop.f32.mrf.mxu1 }
 0x112   :  { %v283_v36 = vmul.f32 %v836_v26, %v836_v26 }
 0x113   :  { %v838_v27 = vpop.f32.mrf.mxu1 }
 0x114   :  { %v281_v38 = vmul.f32 %v838_v27, %v838_v27 }
 0x115   :  { %v840_v28 = vpop.f32.mrf.mxu1 }
 0x116   :  { %v286_v34 = vmul.f32 %v840_v28, %v840_v28 }
 0x117   :  { %v842_v29 = vpop.f32.mrf.mxu1 }
 0x118   :  { %v284_v35 = vmul.f32 %v842_v29, %v842_v29 }
 0x119   :  { %v844_v30 = vpop.f32.mrf.mxu1 }
 0x11a   :  { %v287_v31 = vmul.f32 %v844_v30, %v844_v30 }
 0x11b   :  { %v848_v32 = vpop.f32.mrf.mxu1 }
 0x11c   :  { %318 = vadd.xlane.f32.xlu0 %v287_v31  ;;  %v285_v33 = vmul.f32 %v848_v32, %v848_v32 }
 0x11e   :  { %314 = vadd.xlane.f32.xlu1 %v285_v33 }
 0x120   :  { %316 = vadd.xlane.f32.xlu0 %v286_v34 }
 0x122   :  { %312 = vadd.xlane.f32.xlu1 %v284_v35 }
 0x124   :  { %310 = vadd.xlane.f32.xlu0 %v283_v36 }
 0x126   :  { %308 = vadd.xlane.f32.xlu1 %v282_v37 }
 0x128   :  { %306 = vadd.xlane.f32.xlu0 %v281_v38 }
 0x12a   :  { %304 = vadd.xlane.f32.xlu1 %v280_v39 }
 0x12c   :  { %302 = vadd.xlane.f32.xlu0 %v279_v40 }
 0x12e   :  { %300 = vadd.xlane.f32.xlu1 %v278_v41 }
 0x130   :  { %298 = vadd.xlane.f32.xlu0 %v277_v42 }
 0x132   :  { %296 = vadd.xlane.f32.xlu1 %v276_v44 }
 0x134   :  { %294 = vadd.xlane.f32.xlu0 %v275_v45 }
 0x136   :  { %292 = vadd.xlane.f32.xlu1 %v274_v46 }
 0x138   :  { %290 = vadd.xlane.f32.xlu0 %v273_v47 }
 0x13a   :  { %288 = vadd.xlane.f32.xlu1 %v272_v48 }
 0x1a5   :  { %v319_v50 = vpop.xlane.xlu0 %318 }
 0x1a6   :  { %v335_v51 = vadd.f32 1e-12, %v319_v50 }
 0x1a7   :  { %v315_v52 = vpop.xlane.xlu1 %314 }
 0x1a8   :  { %665 = vrsqrt.f32 %v335_v51  ;;  %v333_v54 = vadd.f32 1e-12, %v315_v52 }
 0x1a9   :  { %v317_v53 = vpop.xlane.xlu0 %316 }
 0x1aa   :  { %v334_v55 = vadd.f32 1e-12, %v317_v53 }
 0x1ab   :  { %v313_v56 = vpop.xlane.xlu1 %312 }
 0x1ac   :  { %667 = vrsqrt.f32 %v334_v55  ;;  %v332_v57 = vadd.f32 1e-12, %v313_v56  ;;  %v474_v55 = vpop.f32.mrf.mxu0 }
 0x1ad   :  { %669 = vrsqrt.f32 %v333_v54  ;;  %v311_v58 = vpop.xlane.xlu0 %310 }
 0x1ae   :  { %671 = vrsqrt.f32 %v332_v57  ;;  %v331_v59 = vadd.f32 1e-12, %v311_v58 }
 0x1af   :  { %v309_v60 = vpop.xlane.xlu1 %308 }
 0x1b0   :  { %673 = vrsqrt.f32 %v331_v59  ;;  %v330_v62 = vadd.f32 1e-12, %v309_v60 }
 0x1b1   :  { %v307_v0 = vpop.xlane.xlu0 %306 }
 0x1b2   :  { %675 = vrsqrt.f32 %v330_v62  ;;  %v329_v2 = vadd.f32 1e-12, %v307_v0 }
 0x1b3   :  { %v305_v5 = vpop.xlane.xlu1 %304 }
 0x1b4   :  { %677 = vrsqrt.f32 %v329_v2  ;;  %v328_v6 = vadd.f32 1e-12, %v305_v5 }
 0x1b5   :  { %v666_v61 = vpop.eup %665  ;;  %v303_v9 = vpop.xlane.xlu0 %302 }
 0x1b6   :  { %v367_v63 = vmul.f32 %v666_v61, %v844_v30  ;;  %679 = vrsqrt.f32 %v328_v6  ;;  %v327_v10 = vadd.f32 1e-12, %v303_v9 }
 0x1b7   :  { %v301_v13 = vpop.xlane.xlu1 %300 }
 0x1b8   :  { %588 = vmatpush3.xpose.msra.mxu1 %v367_v63  ;;  %681 = vrsqrt.f32 %v327_v10  ;;  %v326_v14 = vadd.f32 1e-12, %v301_v13 }
 0x1b9   :  { %v668_v1 = vpop.eup %667  ;;  %589 = vmatprep.subr.mxu1 %v767_v43  ;;  %v299_v30 = vpop.xlane.xlu0 %298 }
 0x1ba   :  { %v366_v3 = vmul.f32 %v668_v1, %v840_v28  ;;  %v670_v4 = vpop.eup %669  ;;  %683 = vrsqrt.f32 %v326_v14  ;;  %v325_v31 = vadd.f32 1e-12, %v299_v30 }
 0x1bb   :  { %v365_v7 = vmul.f32 %v670_v4, %v848_v32  ;;  %v672_v8 = vpop.eup %671 }
 0x1bc   :  { %590 = vmatpush3.xpose.msra.mxu1 %v366_v3  ;;  %v364_v11 = vmul.f32 %v672_v8, %v842_v29  ;;  %v297_v29 = vpop.xlane.xlu1 %296  ;;  %685 = vrsqrt.f32 %v325_v31 }
 0x1bd   :  { %591 = vmatprep.subr.mxu1 %v767_v43  ;;  %v674_v12 = vpop.eup %673  ;;  %v324_v34 = vadd.f32 1e-12, %v297_v29 }
 0x1be   :  { %v363_v15 = vmul.f32 %v674_v12, %v836_v26  ;;  %v295_v26 = vpop.xlane.xlu0 %294 }
 0x1bf   :  { %v676_v28 = vpop.eup %675  ;;  %687 = vrsqrt.f32 %v324_v34  ;;  %v323_v37 = vadd.f32 1e-12, %v295_v26 }
 0x1c0   :  { %592 = vmatpush3.xpose.msra.mxu1 %v365_v7  ;;  %v362_v32 = vmul.f32 %v676_v28, %v832_v24  ;;  %v293_v24 = vpop.xlane.xlu1 %292 }
 0x1c1   :  { %593 = vmatprep.subr.mxu1 %v767_v43  ;;  %v678_v33 = vpop.eup %677  ;;  %689 = vrsqrt.f32 %v323_v37  ;;  %v322_v40 = vadd.f32 1e-12, %v293_v24 }
 0x1c2   :  { %v361_v35 = vmul.f32 %v678_v33, %v838_v27  ;;  %v291_v27 = vpop.xlane.xlu0 %290 }
 0x1c3   :  { %v680_v36 = vpop.eup %679  ;;  %691 = vrsqrt.f32 %v322_v40  ;;  %v321_v44 = vadd.f32 1e-12, %v291_v27 }
 0x1c4   :  { %594 = vmatpush3.xpose.msra.mxu1 %v364_v11  ;;  %v360_v38 = vmul.f32 %v680_v36, %v834_v25  ;;  %v289_v25 = vpop.xlane.xlu1 %288 }
 0x1c5   :  { %595 = vmatprep.subr.mxu1 %v767_v43  ;;  %v682_v39 = vpop.eup %681  ;;  %693 = vrsqrt.f32 %v321_v44  ;;  %v320_v47 = vadd.f32 1e-12, %v289_v25 }
 0x1c6   :  { %v359_v41 = vmul.f32 %v682_v39, %v828_v22 }
 0x1c7   :  { %v684_v42 = vpop.eup %683  ;;  %695 = vrsqrt.f32 %v320_v47 }
 0x1c8   :  { %596 = vmatpush3.xpose.msra.mxu1 %v363_v15  ;;  %v358_v45 = vmul.f32 %v684_v42, %v824_v20 }
 0x1c9   :  { %597 = vmatprep.subr.mxu1 %v767_v43  ;;  %v686_v46 = vpop.eup %685 }
 0x1ca   :  { %v357_v48 = vmul.f32 %v686_v46, %v830_v23 }
 0x1cc   :  { %598 = vmatpush3.xpose.msra.mxu1 %v362_v32  ;;  %v688_v49 = vpop.eup %687 }
 0x1cd   :  { %599 = vmatprep.subr.mxu1 %v767_v43  ;;  %v356_v22 = vmul.f32 %v688_v49, %v826_v21 }
 0x1ce   :  { %v690_v50 = vpop.eup %689 }
 0x1cf   :  { %v355_v20 = vmul.f32 %v690_v50, %v820_v18  ;;  %v369_v18 = vld [vmem:[%s938_s2] sm:$0x1] }
 0x1d0   :  { %600 = vmatpush3.xpose.msra.mxu1 %v361_v35  ;;  %v692_v51 = vpop.eup %691 }
 0x1d1   :  { %601 = vmatprep.subr.mxu1 %v767_v43  ;;  %v354_v52 = vmul.f32 %v692_v51, %v816_v16  ;;  %v640_v16 = vpop.f32.mrf.mxu0 }
 0x1d2   :  { %v694_v23 = vpop.eup %693 }
 0x1d3   :  { %v353_v53 = vmul.f32 %v694_v23, %v822_v19  ;;  %v477_v56 = vpop.f32.mrf.mxu0 }
 0x1d4   :  { %602 = vmatpush3.xpose.msra.mxu1 %v360_v38  ;;  %v696_v54 = vpop.eup %695 }
 0x1d5   :  { %603 = vmatprep.subr.mxu1 %v767_v43  ;;  %v352_v21 = vmul.f32 %v696_v54, %v818_v17  ;;  %v641_v57 = vpop.f32.mrf.mxu0 }
 0x1d8   :  { %604 = vmatpush3.xpose.msra.mxu1 %v359_v41 }
 0x1d9   :  { %605 = vmatprep.subr.mxu1 %v767_v43 }
 0x1dc   :  { %606 = vmatpush3.xpose.msra.mxu1 %v358_v45 }
 0x1dd   :  { %607 = vmatprep.subr.mxu1 %v767_v43 }
 0x1e0   :  { %608 = vmatpush3.xpose.msra.mxu1 %v357_v48 }
 0x1e1   :  { %609 = vmatprep.subr.mxu1 %v767_v43 }
 0x1e4   :  { %610 = vmatpush3.xpose.msra.mxu1 %v356_v22 }
 0x1e5   :  { %611 = vmatprep.subr.mxu1 %v767_v43 }
 0x1e8   :  { %612 = vmatpush3.xpose.msra.mxu1 %v355_v20 }
 0x1e9   :  { %613 = vmatprep.subr.mxu1 %v767_v43 }
 0x1ec   :  { %614 = vmatpush3.xpose.msra.mxu1 %v354_v52 }
 0x1ed   :  { %615 = vmatprep.subr.mxu1 %v767_v43 }
 0x1f0   :  { %616 = vmatpush3.xpose.msra.mxu1 %v353_v53 }
 0x1f1   :  { %617 = vmatprep.subr.mxu1 %v767_v43 }
 0x1f4   :  { %618 = vmatpush3.xpose.msra.mxu1 %v352_v21 }
 0x1f7   :  { %620 = vmatmul.mubr.f32.vlgmr.msra.gmra.mxu1 %v369_v18 }
 0x2b7   :  { %v436_v58 = vpop.f32.mrf.mxu1 }
 0x2b8   :  { %v475_v19 = vadd.f32 %v474_v55, %v436_v58 }
 0x2b9   :  { %v621_v59 = vpop.f32.mrf.mxu1 }
 0x2ba   :  { %480 = vst [vmem:[#allocation7] sm:$0x1] %v475_v19 }
 0x2bb   :  { %748 = shalt.err (!%p745_p0)
}
 0x2bc   :  { %490 = dma.vmem_to_hbm [thread:$0]  %s488_s29, 16, %s940_s4, [#allocation4]  }
 0x2bd   :  { %761 = dma.done.wait [#allocation4], 16  }
 0x2be   :  { %762 = vsyncadd [#allocation4], 4294967280 }
 0x2bf   :  { %494 = vsyncpa [#allocation3], 1 }
 0x2c0   :  { %495 = vsyncpa [#allocation6], 1 }
 0x2c1   :  { %496 = vsyncpa [#allocation4], 1 }

</bundles_post_ra>
